<compile_context>
chip_gen: v5e
topology: v5e:2x2
jax: 0.10.0
libtpu: 0.0.40
codegen_flags: <defaults>
</compile_context>

<pallas_src>
import numpy as np
import jax
import jax.numpy as jnp
from jax.experimental import pallas as pl
from jax.experimental.pallas import tpu as pltpu


NEG_PAD_LOGIT = -1e30     # bias for padded class lanes (safe under softmax/argmax)


def _round_up(x, m):
    return (x + m - 1) // m * m


def _pick_row_tile(n_rows, target=512):
    """Row tile (multiple of 8) that divides the padded row count, packs up to
    `target` rows per grid step (feeds the 256-wide MXUs on v6e/v7x; v5e gains
    little past 256 but is not hurt), and keeps >= 2 grid steps, preferring an
    even step count so both v7x TensorCores stay busy."""
    n_pad = _round_up(max(n_rows, 16), 8)
    cands = [t for t in range(8, min(target, n_pad // 2) + 1, 8) if n_pad % t == 0]
    even = [t for t in cands if (n_pad // t) % 2 == 0]
    tile = max(even) if even else max(cands)
    return tile, n_pad


# ----------------------------------------------------------------------------
# Pallas kernel: fused MLP head over one slab of TR packed rows
#   h = relu(x @ W1 + b1)      (dropout = identity, eval mode)
#   o = h @ W2 + b2            (dropout = identity, eval mode)
# ----------------------------------------------------------------------------
def mlp_head_kernel(x_ref, w1_ref, b1_ref, w2_ref, b2_ref, o_ref):
    # bf16 operands on the MXU, f32 accumulation; bias add / ReLU in f32.
    h = jnp.dot(x_ref[...], w1_ref[...], preferred_element_type=jnp.float32)
    h = jnp.maximum(h + b1_ref[...], 0.0)                     # (TR, H) f32
    o = jnp.dot(h.astype(jnp.bfloat16), w2_ref[...],
                preferred_element_type=jnp.float32)           # (TR, Cp) f32
    o_ref[...] = (o + b2_ref[...]).astype(o_ref.dtype)


def supertagger_head(f0_avg, w1, b1, w2, b2, *, row_tile_target=512):
    """Fused Linear -> ReLU -> Linear head over flattened (batch*seq) rows.

    f0_avg : (B, S, E) word-piece-averaged encoder output
    w1, b1 : (E, H), (H,)   first Linear (weight stored (in, out))
    w2, b2 : (H, C), (C,)   second Linear (weight stored (in, out))
    returns: (B, S, Cpad) f32 logits, Cpad = round_up(C, 128); class lanes >= C
             carry ~-1e30 so the padded tensor is safe for argmax/softmax.
    """
    B, S, E = f0_avg.shape
    H = w1.shape[1]
    C = w2.shape[1]
    Cp = _round_up(C, 128)                    # lane-dense stores, full MXU width

    R = B * S
    TR, Rp = _pick_row_tile(R, row_tile_target)
    grid = (Rp // TR,)

    # Flatten rows; pad the row count so every tile is full (padded rows are
    # dropped again when reshaping the output back below).
    rows = f0_avg.reshape(R, E).astype(jnp.bfloat16)
    if Rp != R:
        rows = jnp.concatenate([rows, jnp.zeros((Rp - R, E), jnp.bfloat16)], 0)

    w1_bf16 = w1.astype(jnp.bfloat16)
    b1_2d = b1.reshape(1, H).astype(jnp.float32)
    w2_pad = jnp.zeros((H, Cp), jnp.bfloat16).at[:, :C].set(w2.astype(jnp.bfloat16))
    b2_pad = jnp.full((1, Cp), NEG_PAD_LOGIT, jnp.float32).at[:, :C].set(
        b2.reshape(1, C).astype(jnp.float32))

    # Per-step VMEM footprint (double-buffered activation/output blocks,
    # resident weights, intermediates) -> explicit scoped-VMEM limit.
    per_step_bytes = (
        2 * TR * E * 2 + 2 * TR * Cp * 4                   # x / out blocks
        + 2 * (E * H * 2 + H * 4 + H * Cp * 2 + Cp * 4)    # weights + biases
        + TR * H * 6 + TR * Cp * 4)                        # h (f32 + bf16), o
    vmem_limit = int(min(64 * 1024 * 1024,
                         max(32 * 1024 * 1024, 2 * per_step_bytes)))

    flops = 2 * Rp * (E * H + H * Cp)
    bytes_accessed = (Rp * E * 2 + E * H * 2 + H * 4 + H * Cp * 2 + Cp * 4
                      + Rp * Cp * 4)

    out_rows = pl.pallas_call(
        mlp_head_kernel,
        out_shape=jax.ShapeDtypeStruct((Rp, Cp), jnp.float32),
        grid_spec=pltpu.PrefetchScalarGridSpec(
            num_scalar_prefetch=0,
            grid=grid,
            in_specs=[
                pl.BlockSpec((TR, E), lambda i: (i, 0)),   # packed activation rows
                # Loop-invariant weights (constant index_map -> fetched once).
                pl.BlockSpec((E, H), lambda i: (0, 0)),    # W1 bf16
                pl.BlockSpec((1, H), lambda i: (0, 0)),    # b1 f32
                pl.BlockSpec((H, Cp), lambda i: (0, 0)),   # W2 bf16 (zero-padded)
                pl.BlockSpec((1, Cp), lambda i: (0, 0)),   # b2 f32 (-1e30 pad lanes)
            ],
            out_specs=pl.BlockSpec((TR, Cp), lambda i: (i, 0)),
        ),
        compiler_params=pltpu.CompilerParams(
            dimension_semantics=("parallel",),
            vmem_limit_bytes=vmem_limit,
        ),
        cost_estimate=pl.CostEstimate(
            flops=flops, transcendentals=0, bytes_accessed=bytes_accessed),
    )(rows, w1_bf16, b1_2d, w2_pad, b2_pad)

    out_rows = out_rows[:R] if Rp != R else out_rows
    return out_rows.reshape(B, S, Cp)


# ----------------------------------------------------------------------------
# Word-piece averaging: host bookkeeping + matrix-free segmented mean.
# In the torch loop every read window starts at k >= j while writes land at
# indices < j, so reads always hit original rows and the non-in-place
# gather formulation below is exact.
# ----------------------------------------------------------------------------
def build_word_piece_gather(word_piece_tracked, B, S):
    start = np.tile(np.arange(S, dtype=np.int32), (B, 1))
    end = start + 1
    inv_n = np.ones((B, S), np.float32)
    passthrough = np.ones((B, S), dtype=bool)
    for i in range(B):
        k = 0
        for j, n_piece in enumerate(word_piece_tracked[i]):
            # n_piece <= 0 is degenerate input (torch would write NaN); skip it.
            if j < S and n_piece > 0:
                lo = min(k, S)
                hi = min(k + n_piece, S)   # torch slicing clamps; divisor stays n_piece
                start[i, j] = lo
                end[i, j] = hi
                inv_n[i, j] = 1.0 / float(n_piece)
                passthrough[i, j] = False
            k += n_piece
    return (jnp.asarray(start), jnp.asarray(end), jnp.asarray(inv_n),
            jnp.asarray(passthrough))


def word_piece_average(f0, start, end, inv_n, passthrough):
    """Segmented word-piece mean via exclusive prefix sum + start/end gather.

    O(B*S*E) memory-bound work; replaces the mostly-zero dense (S,S) summation
    matmul (no MXU flops, no (B,S,S) HBM traffic)."""
    B, S, E = f0.shape
    f0 = f0.astype(jnp.float32)
    prefix = jnp.concatenate(
        [jnp.zeros((B, 1, E), jnp.float32), jnp.cumsum(f0, axis=1)], axis=1)
    seg_sum = (jnp.take_along_axis(prefix, end[:, :, None], axis=1)
               - jnp.take_along_axis(prefix, start[:, :, None], axis=1))
    avg = seg_sum * inv_n[:, :, None]
    # Rows the torch loop never writes keep the original encoder output exactly.
    return jnp.where(passthrough[:, :, None], f0, avg)


def base_supertagging_forward(f0, start, end, inv_n, passthrough, w1, b1, w2, b2):
    """Full head forward: word-piece mean + fused MLP (dropout = identity)."""
    f0_avg = word_piece_average(f0, start, end, inv_n, passthrough)
    return supertagger_head(f0_avg, w1, b1, w2, b2)


if __name__ == "__main__":
    # Small, module-consistent shapes (embed_dim shrunk from 768 for the demo;
    # H=1024 is fixed by the module; n_classes is padded to 128 lanes inside).
    B, S = 4, 16          # batch, word-piece sequence length
    E = 64                # embed_dim
    H = 1024              # w_1 hidden size (fixed by the module)
    C = 40                # n_classes

    key = jax.random.PRNGKey(0)
    k_f0, k_w1, k_b1, k_w2, k_b2 = jax.random.split(key, 5)

    # Synthetic encoder output (stands in for MT5 last_hidden_state).
    f0 = jax.random.normal(k_f0, (B, S, E), dtype=jnp.float32)

    # Deterministic parameters (Linear stored as (in, out)).
    w1 = jax.random.normal(k_w1, (E, H), dtype=jnp.float32) * 0.05
    b1 = jax.random.normal(k_b1, (H,), dtype=jnp.float32) * 0.05
    w2 = jax.random.normal(k_w2, (H, C), dtype=jnp.float32) * 0.05
    b2 = jax.random.normal(k_b2, (C,), dtype=jnp.float32) * 0.05

    # Word-piece bookkeeping (each word -> number of sub-word pieces).
    word_piece_tracked = [
        [2, 1, 3, 1],        # 4 words  -> 7 pieces
        [1, 2, 1, 2, 1],     # 5 words  -> 7 pieces
        [3, 3, 2],           # 3 words  -> 8 pieces
        [1] * 10,            # 10 words -> 10 pieces
    ]
    start, end, inv_n, passthrough = build_word_piece_gather(
        word_piece_tracked, B, S)

    fwd = jax.jit(base_supertagging_forward)
    out_padded = jax.block_until_ready(
        fwd(f0, start, end, inv_n, passthrough, w1, b1, w2, b2))

    # Plain f32 reference mirroring the PyTorch forward (eval mode).
    f0_np = np.asarray(f0, np.float32)
    avg_np = f0_np.copy()
    for i in range(B):
        k = 0
        for j, n_piece in enumerate(word_piece_tracked[i]):
            if j < S and n_piece > 0:
                avg_np[i, j] = f0_np[i, k:k + n_piece].sum(axis=0) / n_piece
            k += n_piece
    h_np = np.maximum(avg_np @ np.asarray(w1) + np.asarray(b1), 0.0)
    ref = h_np @ np.asarray(w2) + np.asarray(b2)

    got = np.asarray(out_padded)
    # Padded class lanes must be large-negative (safe under argmax/softmax).
    if got.shape[-1] > C:
        assert np.all(got[:, :, C:] < -1e20), "padded logit lanes not masked"
    # bf16 MXU operands with f32 accumulation vs. pure-f32 torch math.
    np.testing.assert_allclose(got[:, :, :C], ref, rtol=3e-2, atol=1.5e-2)

    print("KERNEL_OK")
</pallas_src>

<mosaic_0001>
module attributes {stable_mosaic.version = 11 : i64} {
  func.func @mlp_head_kernel(%arg0: i32, %arg1: memref<32x64xbf16, #tpu.memory_space<vmem>>, %arg2: memref<64x1024xbf16, #tpu.memory_space<vmem>>, %arg3: memref<1x1024xf32, #tpu.memory_space<vmem>>, %arg4: memref<1024x128xbf16, #tpu.memory_space<vmem>>, %arg5: memref<1x128xf32, #tpu.memory_space<vmem>>, %arg6: memref<32x128xf32, #tpu.memory_space<vmem>>) attributes {dimension_semantics = [#tpu.dimension_semantics<parallel>], iteration_bounds = array<i64: 2>, scalar_prefetch = 0 : i64, scratch_operands = 0 : i64, tpu.core_type = #tpu.core_type<tc>, window_params = [{transform_indices = @transform_0, window_bounds = array<i64: 32, 64>}, {pipeline_mode = #tpu.pipeline_mode<synchronous>, transform_indices = @transform_1, window_bounds = array<i64: 64, 1024>}, {pipeline_mode = #tpu.pipeline_mode<synchronous>, transform_indices = @transform_2, window_bounds = array<i64: 1, 1024>}, {pipeline_mode = #tpu.pipeline_mode<synchronous>, transform_indices = @transform_3, window_bounds = array<i64: 1024, 128>}, {pipeline_mode = #tpu.pipeline_mode<synchronous>, transform_indices = @transform_4, window_bounds = array<i64: 1, 128>}, {transform_indices = @transform_5, window_bounds = array<i64: 32, 128>}]} {
    %c0 = arith.constant 0 : index
    %c0_0 = arith.constant 0 : index
    %0 = vector.load %arg1[%c0, %c0_0] : memref<32x64xbf16, #tpu.memory_space<vmem>>, vector<32x64xbf16>
    %c0_1 = arith.constant 0 : index
    %c0_2 = arith.constant 0 : index
    %1 = vector.load %arg2[%c0_1, %c0_2] : memref<64x1024xbf16, #tpu.memory_space<vmem>>, vector<64x1024xbf16>
    %cst = arith.constant dense<0.000000e+00> : vector<32x1024xf32>
    %2 = tpu.matmul %0, %1, %cst {dimension_numbers = #tpu.dot_dimension_numbers<[1], [0], [0], [1], [0, 0, 1, 1], [], []>} : vector<32x64xbf16>, vector<64x1024xbf16>, vector<32x1024xf32> -> vector<32x1024xf32>
    %c0_3 = arith.constant 0 : index
    %c0_4 = arith.constant 0 : index
    %3 = vector.load %arg3[%c0_3, %c0_4] : memref<1x1024xf32, #tpu.memory_space<vmem>>, vector<1x1024xf32>
    %4 = vector.broadcast %3 : vector<1x1024xf32> to vector<32x1024xf32>
    %5 = arith.addf %2, %4 : vector<32x1024xf32>
    %cst_5 = arith.constant 0.000000e+00 : f32
    %6 = vector.broadcast %cst_5 : f32 to vector<32x1024xf32>
    %7 = arith.maximumf %5, %6 : vector<32x1024xf32>
    %8 = arith.truncf %7 : vector<32x1024xf32> to vector<32x1024xbf16>
    %c0_6 = arith.constant 0 : index
    %c0_7 = arith.constant 0 : index
    %9 = vector.load %arg4[%c0_6, %c0_7] : memref<1024x128xbf16, #tpu.memory_space<vmem>>, vector<1024x128xbf16>
    %cst_8 = arith.constant dense<0.000000e+00> : vector<32x128xf32>
    %10 = tpu.matmul %8, %9, %cst_8 {dimension_numbers = #tpu.dot_dimension_numbers<[1], [0], [0], [1], [0, 0, 1, 1], [], []>} : vector<32x1024xbf16>, vector<1024x128xbf16>, vector<32x128xf32> -> vector<32x128xf32>
    %c0_9 = arith.constant 0 : index
    %c0_10 = arith.constant 0 : index
    %11 = vector.load %arg5[%c0_9, %c0_10] : memref<1x128xf32, #tpu.memory_space<vmem>>, vector<1x128xf32>
    %12 = vector.broadcast %11 : vector<1x128xf32> to vector<32x128xf32>
    %13 = arith.addf %10, %12 : vector<32x128xf32>
    %c0_11 = arith.constant 0 : index
    %c0_12 = arith.constant 0 : index
    %14 = vector.load %arg6[%c0_11, %c0_12] : memref<32x128xf32, #tpu.memory_space<vmem>>, vector<32x128xf32>
    tpu.vector_store %arg6[%c0_11, %c0_12], %13 {strides = array<i32>} : memref<32x128xf32, #tpu.memory_space<vmem>>, vector<32x128xf32>,
    return
  }
  func.func @transform_0(%arg0: i32) -> (i32, i32) {
    %c0_i32 = arith.constant 0 : i32
    %c0_i32_0 = arith.constant 0 : i32
    return %arg0, %c0_i32 : i32, i32
  }
  func.func @transform_1(%arg0: i32) -> (i32, i32) {
    %c0_i32 = arith.constant 0 : i32
    %c0_i32_0 = arith.constant 0 : i32
    %c0_i32_1 = arith.constant 0 : i32
    return %c0_i32, %c0_i32_0 : i32, i32
  }
  func.func @transform_2(%arg0: i32) -> (i32, i32) {
    %c0_i32 = arith.constant 0 : i32
    %c0_i32_0 = arith.constant 0 : i32
    %c0_i32_1 = arith.constant 0 : i32
    return %c0_i32, %c0_i32_0 : i32, i32
  }
  func.func @transform_3(%arg0: i32) -> (i32, i32) {
    %c0_i32 = arith.constant 0 : i32
    %c0_i32_0 = arith.constant 0 : i32
    %c0_i32_1 = arith.constant 0 : i32
    return %c0_i32, %c0_i32_0 : i32, i32
  }
  func.func @transform_4(%arg0: i32) -> (i32, i32) {
    %c0_i32 = arith.constant 0 : i32
    %c0_i32_0 = arith.constant 0 : i32
    %c0_i32_1 = arith.constant 0 : i32
    return %c0_i32, %c0_i32_0 : i32, i32
  }
  func.func @transform_5(%arg0: i32) -> (i32, i32) {
    %c0_i32 = arith.constant 0 : i32
    %c0_i32_0 = arith.constant 0 : i32
    return %arg0, %c0_i32 : i32, i32
  }
}

</mosaic_0001>

<bundles_post_ra>
// kernel: base_supertagging_forward.1
= control target key start
LH: loop header
LB: loop body
LE: loop exit
PB: predicated region body
PF: predicated region fallthrough
CT: control target
= control target key end

     0   :  { %10 = vsyncpa [#allocation3], 0  ;;  %s2602_s0 = inlined_call_operand.vmem [shape: bf16[64,64], index: 0, kind: input, shape index: {}]   ;;  %s2603_s1 = inlined_call_operand.vmem [shape: bf16[64,1024], index: 1, kind: input, shape index: {}]   ;;  %s2604_s2 = inlined_call_operand.vmem [shape: f32[1,1024], index: 2, kind: input, shape index: {}]   ;;  %s2605_s3 = inlined_call_operand.vmem [shape: bf16[1024,128], index: 3, kind: input, shape index: {}]   ;;  %s2606_s4 = inlined_call_operand.vmem [shape: f32[1,128], index: 4, kind: input, shape index: {}]   ;;  %s2607_s5 = inlined_call_operand.hbm [shape: f32[64,128], index: 5, kind: output, shape index: {}]  }
   0x1   :  { %12 = vsyncpa [#allocation3 + $0x1], 0  ;;  %s2065_s18 = smov 0   ;;  %s2067_s19 = smov 0  }
   0x2   :  { %s2069_s20 = smov 0   ;;  %s2071_s21 = smov 0  }
   0x3 LB: > { %s2086_s22 = sadd.s32 4294967295, %s2031_s21   ;;  %s1408_s23 = sadd.s32 4294967294, %s2031_s21   ;;  %s2031_s21 = sphi %s2071_s21, %s2613_s21   ;;  %s2027_s20 = sphi %s2069_s20, %s2612_s20   ;;  %s2023_s19 = sphi %s2067_s19, %s2611_s19   ;;  %s2019_s18 = sphi %s2065_s18, %s2610_s18  }
   0x4   : > { %s2090_s24 = sadd.s32 1, %s2031_s21   ;;  %s135_s25 = sadd.s32 1, %s2027_s20 }
   0x5   : > { %s132_s26 = ssub.s32 %s2031_s21, %s2090_s24  ;;  %p145_p0 = scmp.ne.s32.totalorder %s2027_s20, %s2023_s19 }
   0x6   : > { %p133_p1 = scmp.eq.s32.totalorder %s132_s26, 0  ;;  %p146_p2 = scmp.eq.s32.totalorder %s2086_s22, 1 }
   0x7   : > { %p151_p3 = scmp.ne.s32.totalorder %s2023_s19, %s2019_s18  ;;  %p152_p4 = scmp.eq.s32.totalorder %s1408_s23, 1 }
   0x8   : > { %s2101_s27 = scalar_select %p133_p1, %s2027_s20, %s135_s25  }
   0x9   : > { %p2103_p5 = por %p146_p2, %p145_p0  ;;  %p2107_p6 = por %p152_p4, %p151_p3 }
   0xa   : > { %p1411_p7 = scmp.ge.s32.totalorder %s2031_s21, 1  ;;  %p191_p8 = scmp.lt.s32.totalorder %s2031_s21, 3 }
   0xc   : > { %p192_p9 = pnand %p1411_p7, %p191_p8 }
   0xd   : > { %s1413_s30 = sshll.u32 (!%p192_p9), %s2086_s22, 2  ;;  %s216_s17 = sand.u32 (!%p192_p9), 1, %s2023_s19  }
   0xe   : > { %195 = sbr.rel (%p192_p9) target bundleno = 381 (0x17d), region = 40  ;;  %p220_p10 = scmp.lt.s32.totalorder (!%p192_p9), %s1413_s30, 7 }
   0xf   : > { %s1412_s25 = sshll.u32 (!%p192_p9), %s216_s17, 5  ;;  %s1926_s26 = sshll.u32 (!%p192_p9), %s2086_s22, 5 }
  0x10   : > { %s1342_s7 = scalar_lea.hbm (!%p192_p9), %s2607_s5, %s1926_s26  ;;  %s1331_s22 = scalar_lea.sflag (!%p192_p9), [#allocation3], %s216_s17 }
  0x11   : > { %s1345_s9 = sshll.u32 (!%p192_p9), %s1342_s7, 4  ;;  %s1989_s14 = scalar_lea.hbm (!%p192_p9), %s2607_s5, 64  ;;  %s1346_s9 = int_to_ptr.hbm [resolvable:$true] %s1345_s9 }
  0x12   : > { %s1983_s10 = sshra.s32 (!%p192_p9), %s1346_s9, 4  ;;  %s1984_s10 = int_to_ptr.hbm [resolvable:$true] %s1983_s10 }
  0x13   : > { %v1521_v0 = vld [vmem:[%s2603_s1 + $0xc0] sm:$0xf]  ;;  %v1854_v2 = vld [vmem:[%s2603_s1 + $0xc4] sm:$0xf]  ;;  %v1529_v5 = vld [vmem:[%s2603_s1 + $0xc8] sm:$0xf]  ;;  %p1990_p0 = scmp.lt.s32.totalorder %s1984_s10, %s2607_s5 }
  0x14   : > { %v1858_v1 = vld [vmem:[%s2603_s1 + $0xdc] sm:$0xf0]  ;;  %v1523_v4 = vld [vmem:[%s2603_s1 + $0xe0] sm:$0xf0]  ;;  %v1859_v6 = vld [vmem:[%s2603_s1 + $0xe4] sm:$0xf0] }
  0x15   : > { %v1522_v3 = vor.u32 %v1858_v1, %v1521_v0  ;;  %v1526_v7 = vor.u32 %v1854_v2, %v1523_v4  ;;  %v1530_v8 = vor.u32 %v1859_v6, %v1529_v5  ;;  %v1855_v9 = vld [vmem:[%s2603_s1 + $0xcc] sm:$0xf]  ;;  %v1489_v11 = vld [vmem:[%s2603_s1 + $0x80] sm:$0xf]  ;;  %v1846_v14 = vld [vmem:[%s2603_s1 + $0x84] sm:$0xf] }
  0x16   : > { %v1531_v10 = vld [vmem:[%s2603_s1 + $0xe8] sm:$0xf0]  ;;  %v1850_v13 = vld [vmem:[%s2603_s1 + $0x9c] sm:$0xf0]  ;;  %v1491_v15 = vld [vmem:[%s2603_s1 + $0xa0] sm:$0xf0] }
  0x17   : > { %462 = vmatpush.bf16.msra.mxu0 %v1522_v3  ;;  %v1534_v12 = vor.u32 %v1855_v9, %v1531_v10  ;;  %481 = vmatpush.bf16.msra.mxu1 %v1526_v7  ;;  %v1490_v16 = vor.u32 %v1850_v13, %v1489_v11  ;;  %v1494_v17 = vor.u32 %v1846_v14, %v1491_v15  ;;  %v1497_v18 = vld [vmem:[%s2603_s1 + $0x88] sm:$0xf]  ;;  %v1847_v20 = vld [vmem:[%s2603_s1 + $0x8c] sm:$0xf]  ;;  %v1457_v23 = vld [vmem:[%s2603_s1 + $0x40] sm:$0xf] }
  0x18   : > { %500 = vmatpush.bf16.msra.mxu2 %v1530_v8  ;;  %v1851_v19 = vld [vmem:[%s2603_s1 + $0xa4] sm:$0xf0]  ;;  %v1499_v22 = vld [vmem:[%s2603_s1 + $0xa8] sm:$0xf0]  ;;  %v1842_v24 = vld [vmem:[%s2603_s1 + $0x5c] sm:$0xf0] }
  0x19   : > { %519 = vmatpush.bf16.msra.mxu3 %v1534_v12  ;;  %v1498_v21 = vor.u32 %v1851_v19, %v1497_v18  ;;  %v1502_v25 = vor.u32 %v1847_v20, %v1499_v22  ;;  %v1838_v26 = vld [vmem:[%s2603_s1 + $0x44] sm:$0xf]  ;;  %v1465_v28 = vld [vmem:[%s2603_s1 + $0x48] sm:$0xf]  ;;  %v1458_v29 = vor.u32 %v1842_v24, %v1457_v23  ;;  %v1839_v31 = vld [vmem:[%s2603_s1 + $0x4c] sm:$0xf] }
  0x1a   : > { %v1459_v27 = vld [vmem:[%s2603_s1 + $0x60] sm:$0xf0]  ;;  %v1843_v30 = vld [vmem:[%s2603_s1 + $0x64] sm:$0xf0]  ;;  %v1467_v32 = vld [vmem:[%s2603_s1 + $0x68] sm:$0xf0] }
  0x1b   : > { %463 = vmatpush.bf16.msra.mxu0 %v1490_v16  ;;  %482 = vmatpush.bf16.msra.mxu1 %v1494_v17  ;;  %v1462_v33 = vor.u32 %v1838_v26, %v1459_v27  ;;  %v1466_v34 = vor.u32 %v1843_v30, %v1465_v28  ;;  %v1425_v35 = vld [vmem:[%s2603_s1] sm:$0xf]  ;;  %v1830_v37 = vld [vmem:[%s2603_s1 + $0x4] sm:$0xf]  ;;  %v1470_v38 = vor.u32 %v1839_v31, %v1467_v32  ;;  %v1433_v40 = vld [vmem:[%s2603_s1 + $0x8] sm:$0xf] }
  0x1c   : > { %501 = vmatpush.bf16.msra.mxu2 %v1498_v21  ;;  %v1834_v36 = vld [vmem:[%s2603_s1 + $0x1c] sm:$0xf0]  ;;  %v1427_v39 = vld [vmem:[%s2603_s1 + $0x20] sm:$0xf0]  ;;  %v1835_v41 = vld [vmem:[%s2603_s1 + $0x24] sm:$0xf0] }
  0x1d   : > { %520 = vmatpush.bf16.msra.mxu3 %v1502_v25  ;;  %v1831_v42 = vld [vmem:[%s2603_s1 + $0xc] sm:$0xf]  ;;  %v1426_v44 = vor.u32 %v1834_v36, %v1425_v35  ;;  %v1545_v45 = vld [vmem:[%s2603_s1 + $0xd8] sm:$0xf]  ;;  %v1430_v47 = vor.u32 %v1830_v37, %v1427_v39  ;;  %v1434_v48 = vor.u32 %v1835_v41, %v1433_v40  ;;  %v1857_v49 = vld [vmem:[%s2603_s1 + $0xdc] sm:$0xf] }
  0x1e   : > { %v1435_v43 = vld [vmem:[%s2603_s1 + $0x28] sm:$0xf0]  ;;  %v1861_v46 = vld [vmem:[%s2603_s1 + $0xf4] sm:$0xf0]  ;;  %v1547_v50 = vld [vmem:[%s2603_s1 + $0xf8] sm:$0xf0] }
  0x1f   : > { %464 = vmatpush.bf16.msra.mxu0 %v1458_v29  ;;  %483 = vmatpush.bf16.msra.mxu1 %v1462_v33  ;;  %v1537_v51 = vld [vmem:[%s2603_s1 + $0xd0] sm:$0xf]  ;;  %v1438_v52 = vor.u32 %v1831_v42, %v1435_v43  ;;  %s2615_s30 = smov (!%p220_p10, %s1413_s30), 7  ;;  %v1546_v53 = vor.u32 %v1861_v46, %v1545_v45  ;;  %v1513_v55 = vld [vmem:[%s2603_s1 + $0x98] sm:$0xf]  ;;  %v1550_v56 = vor.u32 %v1857_v49, %v1547_v50  ;;  %vm451_vm0 = vcmask 523264  }
  0x20   : > { %502 = vmatpush.bf16.msra.mxu2 %v1466_v34  ;;  %v1860_v54 = vld [vmem:[%s2603_s1 + $0xec] sm:$0xf0]  ;;  %v1853_v58 = vld [vmem:[%s2603_s1 + $0xb4] sm:$0xf0]  ;;  %v1856_v59 = vld [vmem:[%s2603_s1 + $0xd4] sm:$0xf] }
  0x21   : > { %521 = vmatpush.bf16.msra.mxu3 %v1470_v38  ;;  %v1538_v57 = vor.u32 %v1860_v54, %v1537_v51  ;;  %v1539_v60 = vld [vmem:[%s2603_s1 + $0xf0] sm:$0xf0]  ;;  %s1414_s11 = sshll.u32 %s2615_s30, 2  ;;  %v1849_v61 = vld [vmem:[%s2603_s1 + $0x9c] sm:$0xf]  ;;  %v1514_v2 = vor.u32 %v1853_v58, %v1513_v55  ;;  %v1867_v42 = vld [vmem:[%s2605_s3 + $0x28] sm:$0xff] }
  0x22   : > { %v1515_v62 = vld [vmem:[%s2603_s1 + $0xb8] sm:$0xf0]  ;;  %s2249_s23 = scalar_lea.vmem %s2602_s0, %s1414_s11  ;;  %v1505_v63 = vld [vmem:[%s2603_s1 + $0x90] sm:$0xf]  ;;  %v1542_v3 = vor.u32 %v1856_v59, %v1539_v60  ;;  %v1481_v4 = vld [vmem:[%s2603_s1 + $0x58] sm:$0xf] }
  0x23   : > { %465 = vmatpush.bf16.msra.mxu0 %v1426_v44  ;;  %484 = vmatpush.bf16.msra.mxu1 %v1430_v47  ;;  %v1852_v0 = vld [vmem:[%s2603_s1 + $0xac] sm:$0xf0]  ;;  %v2258_v1 = vld [vmem:[%s2249_s23] sm:$0xff]  ;;  %v1845_v5 = vld [vmem:[%s2603_s1 + $0x74] sm:$0xf0]  ;;  %v1518_v6 = vor.u32 %v1849_v61, %v1515_v62  ;;  %s1985_s11 = scalar_lea.hbm %s1984_s10, 32 }
  0x24   : > { %503 = vmatpush.bf16.msra.mxu2 %v1434_v48  ;;  %v1506_v7 = vor.u32 %v1852_v0, %v1505_v63  ;;  %v1848_v8 = vld [vmem:[%s2603_s1 + $0x94] sm:$0xf]  ;;  %v1841_v10 = vld [vmem:[%s2603_s1 + $0x5c] sm:$0xf]  ;;  %v1473_v12 = vld [vmem:[%s2603_s1 + $0x50] sm:$0xf]  ;;  %v1482_v14 = vor.u32 %v1845_v5, %v1481_v4  ;;  %p1986_p11 = scmp.ne.s32.totalorder %s1984_s10, %s1985_s11  ;;  %p1991_p1 = scmp.lt.s32.totalorder %s1989_s14, %s1985_s11 }
  0x25   : > { %522 = vmatpush.bf16.msra.mxu3 %v1438_v52  ;;  %v1507_v9 = vld [vmem:[%s2603_s1 + $0xb0] sm:$0xf0]  ;;  %v1483_v11 = vld [vmem:[%s2603_s1 + $0x78] sm:$0xf0]  ;;  %v1844_v13 = vld [vmem:[%s2603_s1 + $0x6c] sm:$0xf0] }
  0x26   : > { %1551 = vmatmul.msk.bf16.vlgmr.msra.gmra.mxu0 %vm451_vm0, %v2258_v1  ;;  %1553 = vmatmul.msk.bf16.vlgmr.msra.gmra.mxu1 %vm451_vm0, %v2258_v1  ;;  %v1510_v15 = vor.u32 %v1848_v8, %v1507_v9  ;;  %v1449_v16 = vld [vmem:[%s2603_s1 + $0x18] sm:$0xf]  ;;  %v1840_v18 = vld [vmem:[%s2603_s1 + $0x54] sm:$0xf]  ;;  %v1486_v19 = vor.u32 %v1841_v10, %v1483_v11  ;;  %v1474_v20 = vor.u32 %v1844_v13, %v1473_v12  ;;  %v1833_v22 = vld [vmem:[%s2603_s1 + $0x1c] sm:$0xf]  ;;  %p1987_p12 = pnand %p1986_p11, %p2103_p5  ;;  %p1992_p2 = por %p1991_p1, %p1990_p0 }
  0x27   : > { %538 = vmatpush.bf16.msrb.mxu0 %v1538_v57  ;;  %1555 = vmatmul.msk.bf16.vlgmr.msra.gmra.mxu2 %vm451_vm0, %v2258_v1  ;;  %v1837_v17 = vld [vmem:[%s2603_s1 + $0x34] sm:$0xf0]  ;;  %v1475_v21 = vld [vmem:[%s2603_s1 + $0x70] sm:$0xf0]  ;;  %v1451_v23 = vld [vmem:[%s2603_s1 + $0x38] sm:$0xf0] }
  0x28   : > { %576 = vmatpush.bf16.msrb.mxu2 %v1546_v53  ;;  %1557 = vmatmul.msk.bf16.vlgmr.msra.gmra.mxu3 %vm451_vm0, %v2258_v1  ;;  %v1441_v24 = vld [vmem:[%s2603_s1 + $0x10] sm:$0xf]  ;;  %v1450_v26 = vor.u32 %v1837_v17, %v1449_v16  ;;  %v1478_v27 = vor.u32 %v1840_v18, %v1475_v21  ;;  %v1454_v28 = vor.u32 %v1833_v22, %v1451_v23  ;;  %v1832_v30 = vld [vmem:[%s2603_s1 + $0x14] sm:$0xf]  ;;  %v1829_v33 = vld [vmem:[%s2249_s23 + $0x8] sm:$0xff]  ;;  %s2562_s23 = scalar_lea.vmem [#allocation2], %s1412_s25  ;;  %p1988_p13 = pneg %p1987_p12 }
  0x29   : > { %595 = vmatpush.bf16.msrb.mxu3 %v1550_v56  ;;  %557 = vmatpush.bf16.msrb.mxu1 %v1542_v3  ;;  %v1836_v25 = vld [vmem:[%s2603_s1 + $0x2c] sm:$0xf0]  ;;  %v1443_v31 = vld [vmem:[%s2603_s1 + $0x30] sm:$0xf0]  ;;  %v1869_v34 = vld [vmem:[%s2605_s3 + $0x38] sm:$0xff]  ;;  %s1343_s8 = sshll.u32 %s2562_s23, 4  ;;  %s1344_s8 = int_to_ptr.vmem [resolvable:$true] %s1343_s8 }
  0x2a   : > { %v1442_v29 = vor.u32 %v1836_v25, %v1441_v24  ;;  %v1446_v32 = vor.u32 %v1832_v30, %v1443_v31  ;;  %v1877_v35 = vld [vmem:[%s2605_s3 + $0x78] sm:$0xff]  ;;  %v1868_v38 = vld [vmem:[%s2605_s3 + $0x30] sm:$0xff]  ;;  %v1875_v43 = vld [vmem:[%s2605_s3 + $0x68] sm:$0xff]  ;;  %p1993_p3 = pnand %p1992_p2, %p1988_p13 }
  0x2b   : > { %539 = vmatpush.bf16.msrb.mxu0 %v1506_v7  ;;  %v1885_v36 = vld [vmem:[%s2605_s3 + $0xb8] sm:$0xff]  ;;  %v1876_v39 = vld [vmem:[%s2605_s3 + $0x70] sm:$0xff]  ;;  %v1883_v44 = vld [vmem:[%s2605_s3 + $0xa8] sm:$0xff] }
  0x2c   : > { %577 = vmatpush.bf16.msrb.mxu2 %v1514_v2  ;;  %v1893_v37 = vld [vmem:[%s2605_s3 + $0xf8] sm:$0xff]  ;;  %v1884_v40 = vld [vmem:[%s2605_s3 + $0xb0] sm:$0xff]  ;;  %v1891_v45 = vld [vmem:[%s2605_s3 + $0xe8] sm:$0xff] }
  0x2d   : > { %596 = vmatpush.bf16.msrb.mxu3 %v1518_v6  ;;  %558 = vmatpush.bf16.msrb.mxu1 %v1510_v15  ;;  %v1892_v41 = vld [vmem:[%s2605_s3 + $0xf0] sm:$0xff]  ;;  %v1866_v46 = vld [vmem:[%s2605_s3 + $0x20] sm:$0xff]  ;;  %v1865_v48 = vld [vmem:[%s2605_s3 + $0x18] sm:$0xff] }
  0x2e   : > { %v1874_v47 = vld [vmem:[%s2605_s3 + $0x60] sm:$0xff]  ;;  %v1873_v49 = vld [vmem:[%s2605_s3 + $0x58] sm:$0xff]  ;;  %v1864_v52 = vld [vmem:[%s2605_s3 + $0x10] sm:$0xff] }
  0x2f   : > { %540 = vmatpush.bf16.msrb.mxu0 %v1474_v20  ;;  %v1882_v50 = vld [vmem:[%s2605_s3 + $0xa0] sm:$0xff]  ;;  %v1872_v53 = vld [vmem:[%s2605_s3 + $0x50] sm:$0xff]  ;;  %v1881_v54 = vld [vmem:[%s2605_s3 + $0x98] sm:$0xff] }
  0x30   : > { %578 = vmatpush.bf16.msrb.mxu2 %v1482_v14  ;;  %v1890_v51 = vld [vmem:[%s2605_s3 + $0xe0] sm:$0xff]  ;;  %v1889_v55 = vld [vmem:[%s2605_s3 + $0xd8] sm:$0xff]  ;;  %v1863_v56 = vld [vmem:[%s2605_s3 + $0x8] sm:$0xff] }
  0x31   : > { %597 = vmatpush.bf16.msrb.mxu3 %v1486_v19  ;;  %559 = vmatpush.bf16.msrb.mxu1 %v1478_v27  ;;  %v1871_v57 = vld [vmem:[%s2605_s3 + $0x48] sm:$0xff]  ;;  %v1880_v58 = vld [vmem:[%s2605_s3 + $0x90] sm:$0xff]  ;;  %v1862_v60 = vld [vmem:[%s2605_s3] sm:$0xff] }
  0x32   : > { %v1888_v59 = vld [vmem:[%s2605_s3 + $0xd0] sm:$0xff]  ;;  %v1870_v61 = vld [vmem:[%s2605_s3 + $0x40] sm:$0xff]  ;;  %v1879_v62 = vld [vmem:[%s2605_s3 + $0x88] sm:$0xff] }
  0x33   : > { %541 = vmatpush.bf16.msrb.mxu0 %v1442_v29  ;;  %v1887_v63 = vld [vmem:[%s2605_s3 + $0xc8] sm:$0xff]  ;;  %v1901_v0 = vld [vmem:[%s2605_s3 + $0x138] sm:$0xff]  ;;  %v1878_v2 = vld [vmem:[%s2605_s3 + $0x80] sm:$0xff] }
  0x34   : > { %579 = vmatpush.bf16.msrb.mxu2 %v1450_v26  ;;  %v1886_v3 = vld [vmem:[%s2605_s3 + $0xc0] sm:$0xff]  ;;  %v1900_v4 = vld [vmem:[%s2605_s3 + $0x130] sm:$0xff]  ;;  %v1917_v6 = vld [vmem:[%s2605_s3 + $0x1b8] sm:$0xff] }
  0x35   : > { %598 = vmatpush.bf16.msrb.mxu3 %v1454_v28  ;;  %560 = vmatpush.bf16.msrb.mxu1 %v1446_v32  ;;  %v1908_v5 = vld [vmem:[%s2605_s3 + $0x170] sm:$0xff]  ;;  %v1925_v7 = vld [vmem:[%s2605_s3 + $0x1f8] sm:$0xff]  ;;  %v1899_v8 = vld [vmem:[%s2605_s3 + $0x128] sm:$0xff] }
  0x36   : > { %1552 = vmatmul.msk.bf16.gmra.mxu0 %vm451_vm0, %v1829_v33  ;;  %1554 = vmatmul.msk.bf16.gmra.mxu1 %vm451_vm0, %v1829_v33  ;;  %v1907_v9 = vld [vmem:[%s2605_s3 + $0x168] sm:$0xff]  ;;  %v1916_v10 = vld [vmem:[%s2605_s3 + $0x1b0] sm:$0xff]  ;;  %v1898_v12 = vld [vmem:[%s2605_s3 + $0x120] sm:$0xff] }
  0x37   : > { %1556 = vmatmul.msk.bf16.gmra.mxu2 %vm451_vm0, %v1829_v33  ;;  %1174 = vmatpush.bf16.msra.mxu0 %v1869_v34  ;;  %v1924_v11 = vld [vmem:[%s2605_s3 + $0x1f0] sm:$0xff]  ;;  %v1906_v13 = vld [vmem:[%s2605_s3 + $0x160] sm:$0xff]  ;;  %v1915_v14 = vld [vmem:[%s2605_s3 + $0x1a8] sm:$0xff] }
  0x38   : > { %1558 = vmatmul.msk.bf16.gmra.mxu3 %vm451_vm0, %v1829_v33  ;;  %1212 = vmatpush.bf16.msra.mxu2 %v1885_v36  ;;  %v1923_v15 = vld [vmem:[%s2605_s3 + $0x1e8] sm:$0xff]  ;;  %v1897_v16 = vld [vmem:[%s2605_s3 + $0x118] sm:$0xff]  ;;  %v2486_v18 = vld [vmem:[%s2604_s2] sm:$0xff] }
  0x39   : > { %1193 = vmatpush.bf16.msra.mxu1 %v1877_v35  ;;  %1231 = vmatpush.bf16.msra.mxu3 %v1893_v37  ;;  %v1905_v17 = vld [vmem:[%s2605_s3 + $0x158] sm:$0xff]  ;;  %v2489_v21 = vperm.slane %v2486_v18, 0  ;;  %v2492_v22 = vperm.slane %v2486_v18, 1  ;;  %v1914_v23 = vld [vmem:[%s2605_s3 + $0x1a0] sm:$0xff]  ;;  %v1896_v25 = vld [vmem:[%s2605_s3 + $0x110] sm:$0xff] }
  0x3a   : > { %v1922_v24 = vld [vmem:[%s2605_s3 + $0x1e0] sm:$0xff]  ;;  %v1904_v26 = vld [vmem:[%s2605_s3 + $0x150] sm:$0xff]  ;;  %v1913_v29 = vld [vmem:[%s2605_s3 + $0x198] sm:$0xff] }
  0x3b   : > { %1175 = vmatpush.bf16.msra.mxu0 %v1868_v38  ;;  %v1921_v30 = vld [vmem:[%s2605_s3 + $0x1d8] sm:$0xff]  ;;  %v1903_v34 = vld [vmem:[%s2605_s3 + $0x148] sm:$0xff] }
  0x3c   : > { %1213 = vmatpush.bf16.msra.mxu2 %v1884_v40 }
  0x3d   : > { %1194 = vmatpush.bf16.msra.mxu1 %v1876_v39  ;;  %1232 = vmatpush.bf16.msra.mxu3 %v1892_v41  ;;  %v1912_v41 = vld [vmem:[%s2605_s3 + $0x190] sm:$0xff] }
  0x3f   : > { %1176 = vmatpush.bf16.msra.mxu0 %v1867_v42  ;;  %v1920_v42 = vld [vmem:[%s2605_s3 + $0x1d0] sm:$0xff] }
  0x40   : > { %1214 = vmatpush.bf16.msra.mxu2 %v1883_v44  ;;  %v268_v44 = vperm.slane %v2486_v18, 3 }
  0x41   : > { %1195 = vmatpush.bf16.msra.mxu1 %v1875_v43  ;;  %1233 = vmatpush.bf16.msra.mxu3 %v1891_v45  ;;  %v267_v43 = vperm.slane %v2486_v18, 2 }
  0x43   : > { %1177 = vmatpush.bf16.msra.mxu0 %v1866_v46 }
  0x44   : > { %1215 = vmatpush.bf16.msra.mxu2 %v1882_v50 }
  0x45   : > { %1196 = vmatpush.bf16.msra.mxu1 %v1874_v47  ;;  %1234 = vmatpush.bf16.msra.mxu3 %v1890_v51  ;;  %v1894_v47 = vld [vmem:[%s2605_s3 + $0x100] sm:$0xff]  ;;  %v1911_v51 = vld [vmem:[%s2605_s3 + $0x188] sm:$0xff] }
  0x46   : > { %1559 = vmatmul.msk.bf16.vlgmr.msrb.gmra.mxu0 %vm451_vm0, %v2258_v1  ;;  %1561 = vmatmul.msk.bf16.vlgmr.msrb.gmra.mxu1 %vm451_vm0, %v2258_v1 }
  0x47   : > { %1563 = vmatmul.msk.bf16.vlgmr.msrb.gmra.mxu2 %vm451_vm0, %v2258_v1  ;;  %1178 = vmatpush.bf16.msra.mxu0 %v1865_v48  ;;  %v1902_v48 = vld [vmem:[%s2605_s3 + $0x140] sm:$0xff] }
  0x48   : > { %1565 = vmatmul.msk.bf16.vlgmr.msrb.gmra.mxu3 %vm451_vm0, %v2258_v1  ;;  %1216 = vmatpush.bf16.msra.mxu2 %v1881_v54  ;;  %v1909_v1 = vld [vmem:[%s2605_s3 + $0x178] sm:$0xff] }
  0x49   : > { %1197 = vmatpush.bf16.msra.mxu1 %v1873_v49  ;;  %1235 = vmatpush.bf16.msra.mxu3 %v1889_v55 }
  0x4b   : > { %1179 = vmatpush.bf16.msra.mxu0 %v1864_v52  ;;  %v1919_v52 = vld [vmem:[%s2605_s3 + $0x1c8] sm:$0xff] }
  0x4c   : > { %1217 = vmatpush.bf16.msra.mxu2 %v1880_v58 }
  0x4d   : > { %1198 = vmatpush.bf16.msra.mxu1 %v1872_v53  ;;  %1236 = vmatpush.bf16.msra.mxu3 %v1888_v59 }
  0x4f   : > { %1180 = vmatpush.bf16.msra.mxu0 %v1863_v56 }
  0x50   : > { %1218 = vmatpush.bf16.msra.mxu2 %v1879_v62  ;;  %v1918_v62 = vld [vmem:[%s2605_s3 + $0x1c0] sm:$0xff] }
  0x51   : > { %1199 = vmatpush.bf16.msra.mxu1 %v1871_v57  ;;  %1237 = vmatpush.bf16.msra.mxu3 %v1887_v63 }
  0x53   : > { %1181 = vmatpush.bf16.msra.mxu0 %v1862_v60 }
  0x54   : > { %1219 = vmatpush.bf16.msra.mxu2 %v1878_v2 }
  0x55   : > { %1200 = vmatpush.bf16.msra.mxu1 %v1870_v61  ;;  %1238 = vmatpush.bf16.msra.mxu3 %v1886_v3  ;;  %v1910_v61 = vld [vmem:[%s2605_s3 + $0x180] sm:$0xff] }
  0x56   : > { %1560 = vmatmul.msk.bf16.gmra.mxu0 %vm451_vm0, %v1829_v33  ;;  %1562 = vmatmul.msk.bf16.gmra.mxu1 %vm451_vm0, %v1829_v33 }
  0x57   : > { %1564 = vmatmul.msk.bf16.gmra.mxu2 %vm451_vm0, %v1829_v33  ;;  %1250 = vmatpush.bf16.msrb.mxu0 %v1901_v0 }
  0x58   : > { %1566 = vmatmul.msk.bf16.gmra.mxu3 %vm451_vm0, %v1829_v33  ;;  %1288 = vmatpush.bf16.msrb.mxu2 %v1917_v6  ;;  %v1895_v33 = vld [vmem:[%s2605_s3 + $0x108] sm:$0xff] }
  0x59   : > { %1269 = vmatpush.bf16.msrb.mxu1 %v1909_v1  ;;  %1307 = vmatpush.bf16.msrb.mxu3 %v1925_v7 }
  0x5b   : > { %1251 = vmatpush.bf16.msrb.mxu0 %v1900_v4 }
  0x5c   : > { %1289 = vmatpush.bf16.msrb.mxu2 %v1916_v10 }
  0x5d   : > { %1270 = vmatpush.bf16.msrb.mxu1 %v1908_v5  ;;  %1308 = vmatpush.bf16.msrb.mxu3 %v1924_v11 }
  0x5f   : > { %1252 = vmatpush.bf16.msrb.mxu0 %v1899_v8 }
  0x60   : > { %1290 = vmatpush.bf16.msrb.mxu2 %v1915_v14 }
  0x61   : > { %1271 = vmatpush.bf16.msrb.mxu1 %v1907_v9  ;;  %1309 = vmatpush.bf16.msrb.mxu3 %v1923_v15 }
  0x63   : > { %1253 = vmatpush.bf16.msrb.mxu0 %v1898_v12 }
  0x64   : > { %1291 = vmatpush.bf16.msrb.mxu2 %v1914_v23 }
  0x65   : > { %1272 = vmatpush.bf16.msrb.mxu1 %v1906_v13  ;;  %1310 = vmatpush.bf16.msrb.mxu3 %v1922_v24 }
  0x67   : > { %1254 = vmatpush.bf16.msrb.mxu0 %v1897_v16 }
  0x68   : > { %1292 = vmatpush.bf16.msrb.mxu2 %v1913_v29 }
  0x69   : > { %1273 = vmatpush.bf16.msrb.mxu1 %v1905_v17  ;;  %1311 = vmatpush.bf16.msrb.mxu3 %v1921_v30  ;;  %v269_v30 = vperm.slane %v2486_v18, 4 }
  0x6b   : > { %1255 = vmatpush.bf16.msrb.mxu0 %v1896_v25 }
  0x6c   : > { %1293 = vmatpush.bf16.msrb.mxu2 %v1912_v41 }
  0x6d   : > { %1274 = vmatpush.bf16.msrb.mxu1 %v1904_v26  ;;  %1312 = vmatpush.bf16.msrb.mxu3 %v1920_v42 }
  0x6f   : > { %1256 = vmatpush.bf16.msrb.mxu0 %v1895_v33 }
  0x70   : > { %1294 = vmatpush.bf16.msrb.mxu2 %v1911_v51 }
  0x71   : > { %1275 = vmatpush.bf16.msrb.mxu1 %v1903_v34  ;;  %1313 = vmatpush.bf16.msrb.mxu3 %v1919_v52 }
  0x73   : > { %1257 = vmatpush.bf16.msrb.mxu0 %v1894_v47  ;;  %v272_v47 = vperm.slane %v2486_v18, 7 }
  0x74   : > { %1295 = vmatpush.bf16.msrb.mxu2 %v1910_v61 }
  0x75   : > { %1276 = vmatpush.bf16.msrb.mxu1 %v1902_v48  ;;  %1314 = vmatpush.bf16.msrb.mxu3 %v1918_v62 }
  0xa3   : > { %v467_v19 = vpop.f32.mrf.mxu0  ;;  %v486_v20 = vpop.f32.mrf.mxu1 }
  0xa4   : > { %v468_v27 = vadd.f32 %v467_v19, %v2489_v21  ;;  %v487_v28 = vadd.f32 %v486_v20, %v2492_v22 }
  0xa6   : > { %v610_v37 = vmax.f32 %v468_v27, 0.0  ;;  %v611_v38 = vmax.f32 %v487_v28, 0.0 }
  0xaa   : > { %v505_v31 = vpop.f32.mrf.mxu2 }
  0xab   : > { %v524_v32 = vpop.f32.mrf.mxu3  ;;  %v469_v35 = vpop.f32.mrf.mxu0  ;;  %v506_v53 = vadd.f32 %v505_v31, %v267_v43 }
  0xac   : > { %v488_v36 = vpop.f32.mrf.mxu1  ;;  %v470_v39 = vadd.f32 %v469_v35, %v2489_v21  ;;  %v525_v54 = vadd.f32 %v524_v32, %v268_v44 }
  0xad   : > { %v489_v40 = vadd.f32 %v488_v36, %v2492_v22  ;;  %v612_v63 = vmax.f32 %v506_v53, 0.0 }
  0xae   : > { %v618_v45 = vmax.f32 %v470_v39, 0.0  ;;  %v613_v0 = vmax.f32 %v525_v54, 0.0 }
  0xaf   : > { %v619_v46 = vmax.f32 %v489_v40, 0.0 }
  0xb0   : > { %v642_v49 = vpack.c.bf16 %v618_v45, %v610_v37 }
  0xb1   : > { %v643_v50 = vpack.c.bf16 %v619_v46, %v611_v38  ;;  %v271_v46 = vperm.slane %v2486_v18, 6 }
  0xb2   : > { %v507_v55 = vpop.f32.mrf.mxu2  ;;  %1182 = vmatmul.bf16.vlgmr.msra.gmra.mxu0 %v642_v49 }
  0xb3   : > { %v526_v56 = vpop.f32.mrf.mxu3  ;;  %1201 = vmatmul.bf16.vlgmr.msra.gmra.mxu1 %v643_v50  ;;  %v508_v57 = vadd.f32 %v507_v55, %v267_v43  ;;  %v472_v59 = vpop.f32.mrf.mxu0 }
  0xb4   : > { %v527_v58 = vadd.f32 %v526_v56, %v268_v44  ;;  %v491_v60 = vpop.f32.mrf.mxu1  ;;  %v473_v5 = vadd.f32 %v472_v59, %v2489_v21 }
  0xb5   : > { %v620_v1 = vmax.f32 %v508_v57, 0.0  ;;  %v492_v6 = vadd.f32 %v491_v60, %v2492_v22 }
  0xb6   : > { %v621_v2 = vmax.f32 %v527_v58, 0.0  ;;  %v626_v11 = vmax.f32 %v473_v5, 0.0 }
  0xb7   : > { %v644_v3 = vpack.c.bf16 %v620_v1, %v612_v63  ;;  %v627_v12 = vmax.f32 %v492_v6, 0.0 }
  0xb8   : > { %v645_v4 = vpack.c.bf16 %v621_v2, %v613_v0 }
  0xb9   : > { %1220 = vmatmul.bf16.vlgmr.msra.gmra.mxu2 %v644_v3 }
  0xba   : > { %1239 = vmatmul.bf16.vlgmr.msra.gmra.mxu3 %v645_v4  ;;  %v510_v7 = vpop.f32.mrf.mxu2 }
  0xbb   : > { %v529_v8 = vpop.f32.mrf.mxu3  ;;  %v474_v9 = vpop.f32.mrf.mxu0  ;;  %v511_v20 = vadd.f32 %v510_v7, %v267_v43 }
  0xbc   : > { %v493_v10 = vpop.f32.mrf.mxu1  ;;  %v475_v13 = vadd.f32 %v474_v9, %v2489_v21  ;;  %v530_v23 = vadd.f32 %v529_v8, %v268_v44  ;;  %v270_v21 = vperm.slane %v2486_v18, 5 }
  0xbd   : > { %v494_v14 = vadd.f32 %v493_v10, %v2492_v22  ;;  %v628_v31 = vmax.f32 %v511_v20, 0.0 }
  0xbe   : > { %v634_v15 = vmax.f32 %v475_v13, 0.0  ;;  %v629_v22 = vmax.f32 %v530_v23, 0.0 }
  0xbf   : > { %v635_v16 = vmax.f32 %v494_v14, 0.0 }
  0xc0   : > { %v650_v17 = vpack.c.bf16 %v634_v15, %v626_v11 }
  0xc1   : > { %v651_v19 = vpack.c.bf16 %v635_v16, %v627_v12 }
  0xc2   : > { %v512_v24 = vpop.f32.mrf.mxu2  ;;  %1187 = vmatmul.bf16.gmra.mxu0 %v650_v17 }
  0xc3   : > { %v531_v25 = vpop.f32.mrf.mxu3  ;;  %1206 = vmatmul.bf16.gmra.mxu1 %v651_v19  ;;  %v513_v26 = vadd.f32 %v512_v24, %v267_v43  ;;  %v543_v28 = vpop.f32.mrf.mxu0 }
  0xc4   : > { %v532_v27 = vadd.f32 %v531_v25, %v268_v44  ;;  %v562_v29 = vpop.f32.mrf.mxu1  ;;  %v544_v36 = vadd.f32 %v543_v28, %v269_v30 }
  0xc5   : > { %v636_v32 = vmax.f32 %v513_v26, 0.0  ;;  %v563_v37 = vadd.f32 %v562_v29, %v270_v21 }
  0xc6   : > { %v637_v33 = vmax.f32 %v532_v27, 0.0  ;;  %v614_v42 = vmax.f32 %v544_v36, 0.0 }
  0xc7   : > { %v652_v34 = vpack.c.bf16 %v636_v32, %v628_v31  ;;  %v615_v43 = vmax.f32 %v563_v37, 0.0 }
  0xc8   : > { %v653_v35 = vpack.c.bf16 %v637_v33, %v629_v22 }
  0xc9   : > { %1225 = vmatmul.bf16.gmra.mxu2 %v652_v34 }
  0xca   : > { %1244 = vmatmul.bf16.gmra.mxu3 %v653_v35  ;;  %v581_v38 = vpop.f32.mrf.mxu2 }
  0xcb   : > { %v600_v39 = vpop.f32.mrf.mxu3  ;;  %v545_v40 = vpop.f32.mrf.mxu0  ;;  %v582_v52 = vadd.f32 %v581_v38, %v271_v46  ;;  %v1968_v38 = vld [vmem:[%s2606_s4] ss:$0 sm:$0xff] }
  0xcc   : > { %v564_v41 = vpop.f32.mrf.mxu1  ;;  %v546_v44 = vadd.f32 %v545_v40, %v269_v30  ;;  %v601_v53 = vadd.f32 %v600_v39, %v272_v47 }
  0xcd   : > { %v565_v45 = vadd.f32 %v564_v41, %v270_v21  ;;  %v616_v60 = vmax.f32 %v582_v52, 0.0 }
  0xce   : > { %v622_v48 = vmax.f32 %v546_v44, 0.0  ;;  %v617_v61 = vmax.f32 %v601_v53, 0.0 }
  0xcf   : > { %v623_v49 = vmax.f32 %v565_v45, 0.0 }
  0xd0   : > { %v646_v50 = vpack.c.bf16 %v622_v48, %v614_v42 }
  0xd1   : > { %v647_v51 = vpack.c.bf16 %v623_v49, %v615_v43 }
  0xd2   : > { %v583_v54 = vpop.f32.mrf.mxu2  ;;  %1258 = vmatmul.bf16.vlgmr.msrb.gmra.mxu0 %v646_v50 }
  0xd3   : > { %v602_v55 = vpop.f32.mrf.mxu3  ;;  %1277 = vmatmul.bf16.vlgmr.msrb.gmra.mxu1 %v647_v51  ;;  %v584_v56 = vadd.f32 %v583_v54, %v271_v46  ;;  %v548_v58 = vpop.f32.mrf.mxu0 }
  0xd4   : > { %v603_v57 = vadd.f32 %v602_v55, %v272_v47  ;;  %v567_v59 = vpop.f32.mrf.mxu1  ;;  %v549_v1 = vadd.f32 %v548_v58, %v269_v30 }
  0xd5   : > { %v624_v62 = vmax.f32 %v584_v56, 0.0  ;;  %v568_v2 = vadd.f32 %v567_v59, %v270_v21 }
  0xd6   : > { %v625_v63 = vmax.f32 %v603_v57, 0.0  ;;  %v630_v7 = vmax.f32 %v549_v1, 0.0 }
  0xd7   : > { %v648_v0 = vpack.c.bf16 %v624_v62, %v616_v60  ;;  %v631_v8 = vmax.f32 %v568_v2, 0.0 }
  0xd8   : > { %v649_v18 = vpack.c.bf16 %v625_v63, %v617_v61 }
  0xd9   : > { %1296 = vmatmul.bf16.vlgmr.msrb.gmra.mxu2 %v648_v0 }
  0xda   : > { %1315 = vmatmul.bf16.vlgmr.msrb.gmra.mxu3 %v649_v18  ;;  %v586_v3 = vpop.f32.mrf.mxu2 }
  0xdb   : > { %v605_v4 = vpop.f32.mrf.mxu3  ;;  %v550_v5 = vpop.f32.mrf.mxu0  ;;  %v587_v15 = vadd.f32 %v586_v3, %v271_v46 }
  0xdc   : > { %v569_v6 = vpop.f32.mrf.mxu1  ;;  %v551_v9 = vadd.f32 %v550_v5, %v269_v30  ;;  %v606_v16 = vadd.f32 %v605_v4, %v272_v47 }
  0xdd   : > { %v570_v10 = vadd.f32 %v569_v6, %v270_v21  ;;  %v632_v24 = vmax.f32 %v587_v15, 0.0 }
  0xde   : > { %v638_v11 = vmax.f32 %v551_v9, 0.0  ;;  %v633_v25 = vmax.f32 %v606_v16, 0.0 }
  0xdf   : > { %v639_v12 = vmax.f32 %v570_v10, 0.0 }
  0xe0   : > { %v654_v13 = vpack.c.bf16 %v638_v11, %v630_v7 }
  0xe1   : > { %v655_v14 = vpack.c.bf16 %v639_v12, %v631_v8 }
  0xe2   : > { %v588_v17 = vpop.f32.mrf.mxu2  ;;  %1263 = vmatmul.bf16.gmra.mxu0 %v654_v13 }
  0xe3   : > { %v607_v19 = vpop.f32.mrf.mxu3  ;;  %1282 = vmatmul.bf16.gmra.mxu1 %v655_v14  ;;  %v589_v20 = vadd.f32 %v588_v17, %v271_v46 }
  0xe4   : > { %v608_v23 = vadd.f32 %v607_v19, %v272_v47 }
  0xe5   : > { %v640_v26 = vmax.f32 %v589_v20, 0.0 }
  0xe6   : > { %v641_v27 = vmax.f32 %v608_v23, 0.0 }
  0xe7   : > { %v656_v28 = vpack.c.bf16 %v640_v26, %v632_v24 }
  0xe8   : > { %v657_v29 = vpack.c.bf16 %v641_v27, %v633_v25 }
  0xe9   : > { %1301 = vmatmul.bf16.gmra.mxu2 %v656_v28 }
  0xea   : > { %1320 = vmatmul.bf16.gmra.mxu3 %v657_v29 }
 0x12f   : > { %v1183_v30 = vpop.f32.mrf.mxu0 }
 0x130   : > { %v1202_v21 = vpop.f32.mrf.mxu1  ;;  %v1184_v41 = vadd.f32 %v1968_v38, %v1183_v30 }
 0x132   : > { %v1203_v44 = vadd.f32 %v1202_v21, %v1184_v41 }
 0x137   : > { %v1185_v31 = vpop.f32.mrf.mxu0 }
 0x138   : > { %v1204_v22 = vpop.f32.mrf.mxu1  ;;  %v1186_v47 = vadd.f32 %v1968_v38, %v1185_v31 }
 0x13a   : > { %v1205_v52 = vadd.f32 %v1204_v22, %v1186_v47 }
 0x13c   : > { %v1221_v32 = vpop.f32.mrf.mxu2 }
 0x13d   : > { %v1240_v33 = vpop.f32.mrf.mxu3  ;;  %v1222_v46 = vadd.f32 %v1221_v32, %v1203_v44 }
 0x13f   : > { %v1188_v34 = vpop.f32.mrf.mxu0  ;;  %v1241_v51 = vadd.f32 %v1240_v33, %v1222_v46 }
 0x140   : > { %v1207_v35 = vpop.f32.mrf.mxu1  ;;  %v1189_v56 = vadd.f32 %v1968_v38, %v1188_v34 }
 0x142   : > { %v1208_v63 = vadd.f32 %v1207_v35, %v1189_v56 }
 0x144   : > { %v1223_v36 = vpop.f32.mrf.mxu2 }
 0x145   : > { %v1242_v37 = vpop.f32.mrf.mxu3  ;;  %v1224_v55 = vadd.f32 %v1223_v36, %v1205_v52 }
 0x147   : > { %v1190_v39 = vpop.f32.mrf.mxu0  ;;  %v1243_v60 = vadd.f32 %v1242_v37, %v1224_v55 }
 0x148   : > { %v1209_v40 = vpop.f32.mrf.mxu1  ;;  %v1191_v3 = vadd.f32 %v1968_v38, %v1190_v39 }
 0x14a   : > { %v1210_v9 = vadd.f32 %v1209_v40, %v1191_v3 }
 0x14c   : > { %v1226_v42 = vpop.f32.mrf.mxu2 }
 0x14d   : > { %v1245_v43 = vpop.f32.mrf.mxu3  ;;  %v1227_v1 = vadd.f32 %v1226_v42, %v1208_v63 }
 0x14f   : > { %v1259_v45 = vpop.f32.mrf.mxu0  ;;  %v1246_v7 = vadd.f32 %v1245_v43, %v1227_v1 }
 0x150   : > { %v1278_v48 = vpop.f32.mrf.mxu1  ;;  %v1260_v53 = vadd.f32 %v1259_v45, %v1241_v51 }
 0x152   : > { %v1279_v57 = vadd.f32 %v1278_v48, %v1260_v53 }
 0x154   : > { %v1228_v49 = vpop.f32.mrf.mxu2 }
 0x155   : > { %v1247_v50 = vpop.f32.mrf.mxu3  ;;  %v1229_v13 = vadd.f32 %v1228_v49, %v1210_v9 }
 0x157   : > { %v1261_v54 = vpop.f32.mrf.mxu0  ;;  %v1248_v19 = vadd.f32 %v1247_v50, %v1229_v13 }
 0x158   : > { %v1280_v62 = vpop.f32.mrf.mxu1  ;;  %v1262_v0 = vadd.f32 %v1261_v54, %v1243_v60 }
 0x15a   : > { %v1281_v4 = vadd.f32 %v1280_v62, %v1262_v0 }
 0x15c   : > { %v1297_v58 = vpop.f32.mrf.mxu2 }
 0x15d   : > { %v1316_v59 = vpop.f32.mrf.mxu3  ;;  %v1298_v61 = vadd.f32 %v1297_v58, %v1279_v57 }
 0x15f   : > { %v1317_v18 = vadd.f32 %v1316_v59, %v1298_v61  ;;  %v1264_v2 = vpop.f32.mrf.mxu0 }
 0x160   : > { %v1265_v10 = vadd.f32 %v1264_v2, %v1246_v7  ;;  %v1283_v12 = vpop.f32.mrf.mxu1 }
 0x161   : > { %1326 = vst [vmem:[%s2562_s23] sm:$0xff] %v1317_v18 }
 0x162   : > { %v1284_v14 = vadd.f32 %v1283_v12, %v1265_v10 }
 0x164   : > { %v1299_v5 = vpop.f32.mrf.mxu2 }
 0x165   : > { %v1318_v6 = vpop.f32.mrf.mxu3  ;;  %v1300_v8 = vadd.f32 %v1299_v5, %v1281_v4 }
 0x167   : > { %v1319_v11 = vadd.f32 %v1318_v6, %v1300_v8  ;;  %v1266_v15 = vpop.f32.mrf.mxu0 }
 0x168   : > { %v1267_v23 = vadd.f32 %v1266_v15, %v1248_v19  ;;  %v1285_v25 = vpop.f32.mrf.mxu1 }
 0x169   : > { %1327 = vst [vmem:[%s2562_s23 + $0x8] sm:$0xff] %v1319_v11 }
 0x16a   : > { %v1286_v26 = vadd.f32 %v1285_v25, %v1267_v23 }
 0x16c   : > { %v1302_v16 = vpop.f32.mrf.mxu2 }
 0x16d   : > { %v1321_v17 = vpop.f32.mrf.mxu3  ;;  %v1303_v20 = vadd.f32 %v1302_v16, %v1284_v14 }
 0x16f   : > { %v1322_v24 = vadd.f32 %v1321_v17, %v1303_v20 }
 0x171   : > { %1328 = vst [vmem:[%s2562_s23 + $0x10] sm:$0xff] %v1322_v24 }
 0x174   : > { %v1304_v27 = vpop.f32.mrf.mxu2 }
 0x175   : > { %v1305_v28 = vadd.f32 %v1304_v27, %v1286_v26  ;;  %v1323_v29 = vpop.f32.mrf.mxu3 }
 0x177   : > { %v1324_v30 = vadd.f32 %v1323_v29, %v1305_v28 }
 0x179   : > { %1329 = vst [vmem:[%s2562_s23 + $0x18] sm:$0xff] %v1324_v30 }
 0x17a   : > { %1996 = shalt.err (!%p1993_p3)
}
 0x17b   : > { %s2033_s17 = smov 128   ;;  %s2034_s25 = smov 8  }
 0x17c   : > { %1927 = dma.vmem_to_hbm [thread:$0]  (%p2103_p5), %s1344_s8, 512, %s1346_s9, %s1331_s22, %s2033_s17, %s2033_s17, %s2034_s25  }
 0x17d PF: > { %p1933_p4 = scmp.ge.s32.totalorder %s2031_s21, 2  ;;  %s1360_s23 = sand.u32 1, %s2019_s18  }
 0x17e   : > { %s1361_s26 = scalar_lea.sflag [#allocation3], %s1360_s23 }
 0x17f   : > { %p1930_p7 = pnand %p1933_p4, %p2107_p6 }
 0x181   : > { %p1931_p8 = pneg %p1930_p7 }
 0x183   : > { %2014 = dma.done.wait (%p1931_p8), %s1361_s26, 512  }
 0x184   : > { %2016 = vsyncadd (%p1931_p8), %s1361_s26, 4294966784  ;;  %p15_p9 = scmp.ge.s32.totalorder %s2090_s24, 4   ;;  %s2610_s18 = smov %s2023_s19 }
 0x185   : > { %s2611_s19 = smov %s2027_s20  ;;  %s2612_s20 = smov %s2101_s27 }
 0x186   : > { %s2613_s21 = smov %s2090_s24  ;;  %17 = sbr.rel (!%p15_p9) target bundleno = 3 (0x3), region = 75 }
 0x18b   :  { %1367 = vsyncpa [#allocation3], 1 }
 0x18c   :  { %1369 = vsyncpa [#allocation3 + $0x1], 1 }

</bundles_post_ra>
